<compile_context>
chip_gen: v7x
topology: tpu7x:2x2x1
jax: 0.10.0
libtpu: 0.0.40
codegen_flags: <defaults>
</compile_context>

<pallas_src>
import functools
import math

import jax
import jax.numpy as jnp
from jax.experimental import pallas as pl
from jax.experimental.pallas import tpu as pltpu

LANE = 128  # TPU vreg lane width: pad narrow output dims to this for dense stores.


def _round_up(x, m):
    return ((x + m - 1) // m) * m


# ----------------------------------------------------------------------------
# Fused early-exit head kernel (per grid step: one layer, one row tile).
#   class Linear + bbox-MLP layer 1 share one MXU pass over x; then
#   Linear+ReLU, Linear, sigmoid. Intermediates never touch HBM.
# ----------------------------------------------------------------------------
def _early_exit_head_kernel(x_ref, wcat_ref, bcat_ref, w2_ref, b2_ref,
                            w3_ref, b3_ref, logits_ref, boxes_ref, *, c_pad):
    x = x_ref[...]                                              # (tm, H)

    # One 128-lane-aligned MXU pass produces [class logits | MLP hidden 1].
    y = jnp.dot(x, wcat_ref[...], preferred_element_type=jnp.float32)
    y = y + bcat_ref[...]
    logits_ref[...] = y[:, :c_pad].astype(logits_ref.dtype)     # lane-dense store

    # Bbox MLP: ReLU, Linear+ReLU, Linear, sigmoid (padded lanes stay exact 0).
    h = jnp.maximum(y[:, c_pad:], 0.0)                          # (tm, h1_pad)
    h = jnp.dot(h, w2_ref[...], preferred_element_type=jnp.float32) + b2_ref[...]
    h = jnp.maximum(h, 0.0)
    z = jnp.dot(h, w3_ref[...], preferred_element_type=jnp.float32) + b3_ref[...]
    boxes_ref[...] = jax.nn.sigmoid(z).astype(boxes_ref.dtype)  # lane-dense store


# ----------------------------------------------------------------------------
# Layout plumbing: pad / concatenate one layer's weights.
# ----------------------------------------------------------------------------
def _prep_layer(class_w, class_b, mlp, c_pad, h1_pad, o_pad):
    H, C = class_w.shape
    (w1, b1), (w2, b2), (w3, b3) = mlp
    H1, H2, O = w1.shape[1], w2.shape[1], w3.shape[1]
    ncat = c_pad + h1_pad

    # [class head | MLP layer 1], both zero-padded to 128-lane boundaries.
    wcat = jnp.zeros((H, ncat), class_w.dtype)
    wcat = wcat.at[:, :C].set(class_w).at[:, c_pad:c_pad + H1].set(w1)
    bcat = jnp.zeros((1, ncat), class_b.dtype)
    bcat = bcat.at[:, :C].set(class_b).at[:, c_pad:c_pad + H1].set(b1)

    # MLP layer 2: zero rows absorb the zero-padded hidden columns exactly.
    w2p = jnp.zeros((h1_pad, H2), w2.dtype).at[:H1, :].set(w2)
    b2p = b2.reshape(1, H2)

    # MLP layer 3: output dim (4) zero-padded to 128 lanes.
    w3p = jnp.zeros((H2, o_pad), w3.dtype).at[:, :O].set(w3)
    b3p = jnp.zeros((1, o_pad), b3.dtype).at[:, :O].set(b3)
    return wcat, bcat, w2p, b2p, w3p, b3p


def _head_vmem_bytes(tm, H, h1_pad, H2, ncat, c_pad, o_pad, itemsize=4):
    # Weights/biases change along the layer grid axis -> double-buffered.
    weights = H * ncat + ncat + h1_pad * H2 + H2 + H2 * o_pad + o_pad
    tiles = tm * (H + c_pad + o_pad)          # x + both outputs (double-buffered)
    inter = tm * (ncat + H2)                  # in-kernel intermediates (single)
    return (2 * (weights + tiles) + inter) * itemsize


def _choose_tm(L, M, H, h1_pad, H2, ncat, c_pad, o_pad, *, max_tm, vmem_budget):
    tm = min(max_tm, _round_up(M, 8))
    while tm > 8 and _head_vmem_bytes(tm, H, h1_pad, H2, ncat, c_pad,
                                      o_pad) > vmem_budget:
        tm = max(8, _round_up(tm // 2, 8))
    # Guarantee >= 2 total grid steps so the "parallel" axes can shard across
    # v7x's 2 TensorCores / v6e megacore even with a single decoder layer.
    if L * ((M + tm - 1) // tm) < 2 and M > 8:
        tm = _round_up((M + 1) // 2, 8)
    return tm


# ----------------------------------------------------------------------------
# Wrapper: all early-exit layers in one pallas_call.
# ----------------------------------------------------------------------------
def early_exit_heads(hs_layers, class_ws, class_bs, mlp_params, *,
                     max_tm=512, vmem_budget=28 << 20, vmem_limit_bytes=40 << 20):
    """Fused VisTR early-exit heads for ALL decoder layers.

    hs_layers : (L, ..., H)  stacked other_hs[layer] (already permuted).
    class_ws  : list (len L) of (H, C) class_embeds weights, pre-transposed.
    class_bs  : list (len L) of (C,)  class_embeds biases.
    mlp_params: list (len L) of [(w1,b1),(w2,b2),(w3,b3)] of MLP(H, H, 4, 3),
                weights pre-transposed as (in, out).
    Returns (pred_logits (L, ..., C), pred_boxes (L, ..., 4), sigmoided).
    """
    L = hs_layers.shape[0]
    lead = hs_layers.shape[1:-1]
    H = hs_layers.shape[-1]
    M = math.prod(lead)
    C = class_ws[0].shape[1]
    H1 = mlp_params[0][0][0].shape[1]
    H2 = mlp_params[0][1][0].shape[1]
    O = mlp_params[0][2][0].shape[1]

    c_pad = _round_up(C, LANE)
    h1_pad = _round_up(H1, LANE)
    o_pad = _round_up(O, LANE)
    ncat = c_pad + h1_pad

    prepped = [_prep_layer(class_ws[l], class_bs[l], mlp_params[l],
                           c_pad, h1_pad, o_pad) for l in range(L)]
    wcat = jnp.stack([p[0] for p in prepped])   # (L, H,      ncat)
    bcat = jnp.stack([p[1] for p in prepped])   # (L, 1,      ncat)
    w2s = jnp.stack([p[2] for p in prepped])    # (L, h1_pad, H2)
    b2s = jnp.stack([p[3] for p in prepped])    # (L, 1,      H2)
    w3s = jnp.stack([p[4] for p in prepped])    # (L, H2,     o_pad)
    b3s = jnp.stack([p[5] for p in prepped])    # (L, 1,      o_pad)

    tm = _choose_tm(L, M, H, h1_pad, H2, ncat, c_pad, o_pad,
                    max_tm=max_tm, vmem_budget=vmem_budget)
    n_tiles = pl.cdiv(M, tm)
    grid = (L, n_tiles)   # layer axis outer: weights stay resident across row tiles

    # No wrapper-side row padding: Pallas masks the partial last row block and
    # the garbage rows only produce discarded (never-stored) results.
    x = hs_layers.reshape(L, M, H)

    lay = lambda l, i: (l, 0, 0)    # per-layer weights/biases (row-tile invariant)
    rowl = lambda l, i: (l, i, 0)   # per-layer, row-tiled activations/outputs

    kernel = functools.partial(_early_exit_head_kernel, c_pad=c_pad)

    logits_p, boxes_p = pl.pallas_call(
        kernel,
        out_shape=(
            jax.ShapeDtypeStruct((L, M, c_pad), hs_layers.dtype),
            jax.ShapeDtypeStruct((L, M, o_pad), hs_layers.dtype),
        ),
        grid_spec=pl.GridSpec(
            grid=grid,
            in_specs=[
                pl.BlockSpec((None, tm, H), rowl),          # x row tile
                pl.BlockSpec((None, H, ncat), lay),         # [class | MLP1] weights
                pl.BlockSpec((None, 1, ncat), lay),         # [class | MLP1] biases
                pl.BlockSpec((None, h1_pad, H2), lay),      # MLP layer 2 weight
                pl.BlockSpec((None, 1, H2), lay),           # MLP layer 2 bias
                pl.BlockSpec((None, H2, o_pad), lay),       # MLP layer 3 weight (padded)
                pl.BlockSpec((None, 1, o_pad), lay),        # MLP layer 3 bias
            ],
            out_specs=(
                pl.BlockSpec((None, tm, c_pad), rowl),
                pl.BlockSpec((None, tm, o_pad), rowl),
            ),
        ),
        compiler_params=pltpu.CompilerParams(
            # Both grid axes are independent work -> megacore / 2-TC sharding.
            dimension_semantics=("parallel", "parallel"),
            vmem_limit_bytes=vmem_limit_bytes),
    )(x, wcat, bcat, w2s, b2s, w3s, b3s)

    logits = logits_p[:, :, :C].reshape(L, *lead, C)
    boxes = boxes_p[:, :, :O].reshape(L, *lead, O)
    return logits, boxes


# ----------------------------------------------------------------------------
# Deterministic synthetic params + pure-JAX reference.
# ----------------------------------------------------------------------------
def init_linear(key, in_dim, out_dim, dtype=jnp.float32):
    """PyTorch-style nn.Linear init; weight stored pre-transposed as (in, out)."""
    kw, kb = jax.random.split(key)
    scale = 1.0 / jnp.sqrt(jnp.asarray(in_dim, dtype))
    w = jax.random.uniform(kw, (in_dim, out_dim), dtype, -scale, scale)
    b = jax.random.uniform(kb, (out_dim,), dtype, -scale, scale)
    return w, b


def init_mlp_params(key, input_dim, hidden_dim, output_dim, num_layers,
                    dtype=jnp.float32):
    h = [hidden_dim] * (num_layers - 1)
    params = []
    for n, k in zip([input_dim] + h, h + [output_dim]):
        key, kl = jax.random.split(key)
        params.append(init_linear(kl, n, k, dtype))
    return params


def reference_head(hs, class_w, class_b, mlp_params):
    logits = hs @ class_w + class_b
    h = hs
    n = len(mlp_params)
    for i, (w, b) in enumerate(mlp_params):
        h = h @ w + b
        if i < n - 1:
            h = jax.nn.relu(h)
    return logits, jax.nn.sigmoid(h)


if __name__ == "__main__":
    # TODO(synk): backbone, transformer, input_proj conv and the enable_segm
    # branch (MHAttentionMap, MaskHeadSmallConv w/ DeformConv, Conv3d insmask
    # heads) are not translated; the decoder outputs hs are synthesized here.
    key = jax.random.PRNGKey(0)

    # Shapes mirroring the module's early-exit asserts:
    #   other_hs[layer] -> (1, 15, d_model); pred_logits (1, 15, 42); boxes (1, 15, 4).
    batch, num_queries = 1, 15
    hidden_dim = 64                 # small stand-in for transformer.d_model
    num_classes_plus_1 = 42
    early_exit_layer = 2            # number of decoder layers with heads

    key, khs = jax.random.split(key)
    hs_layers = jax.random.normal(
        khs, (early_exit_layer, batch, num_queries, hidden_dim), jnp.float32)

    class_ws, class_bs, mlps = [], [], []
    for _ in range(early_exit_layer):
        key, kc, km = jax.random.split(key, 3)
        cw, cb = init_linear(kc, hidden_dim, num_classes_plus_1)
        class_ws.append(cw)
        class_bs.append(cb)
        mlps.append(init_mlp_params(km, hidden_dim, hidden_dim, 4, 3))

    # Entire early-exit loop = ONE fused pallas_call over a (layers, row_tiles) grid.
    logits_all, boxes_all = early_exit_heads(hs_layers, class_ws, class_bs, mlps)
    logits_all, boxes_all = jax.block_until_ready((logits_all, boxes_all))

    res = [{"pred_logits": logits_all[l], "pred_boxes": boxes_all[l]}
           for l in range(early_exit_layer)]

    for layer in range(early_exit_layer):
        ref_logits, ref_boxes = reference_head(
            hs_layers[layer], class_ws[layer], class_bs[layer], mlps[layer])
        out = res[layer]
        assert out["pred_logits"].shape == (batch, num_queries, num_classes_plus_1), \
            out["pred_logits"].shape
        assert out["pred_boxes"].shape == (batch, num_queries, 4), \
            out["pred_boxes"].shape
        assert jnp.allclose(out["pred_logits"], ref_logits, atol=2e-5, rtol=2e-5), \
            f"pred_logits mismatch at layer {layer}"
        assert jnp.allclose(out["pred_boxes"], ref_boxes, atol=2e-5, rtol=2e-5), \
            f"pred_boxes mismatch at layer {layer}"

    print("KERNEL_OK")
</pallas_src>

<mosaic_0001>
module attributes {stable_mosaic.version = 11 : i64} {
  func.func @_early_exit_head_kernel(%arg0: i32, %arg1: i32, %arg2: memref<1x16x64xf32, #tpu.memory_space<vmem>>, %arg3: memref<1x64x256xf32, #tpu.memory_space<vmem>>, %arg4: memref<1x1x256xf32, #tpu.memory_space<vmem>>, %arg5: memref<1x128x64xf32, #tpu.memory_space<vmem>>, %arg6: memref<1x1x64xf32, #tpu.memory_space<vmem>>, %arg7: memref<1x64x128xf32, #tpu.memory_space<vmem>>, %arg8: memref<1x1x128xf32, #tpu.memory_space<vmem>>, %arg9: memref<1x16x128xf32, #tpu.memory_space<vmem>>, %arg10: memref<1x16x128xf32, #tpu.memory_space<vmem>>) attributes {dimension_semantics = [#tpu.dimension_semantics<parallel>, #tpu.dimension_semantics<parallel>], iteration_bounds = array<i64: 2, 1>, scalar_prefetch = 0 : i64, scratch_operands = 0 : i64, tpu.core_type = #tpu.core_type<tc>, window_params = [{transform_indices = @transform_0, window_bounds = array<i64: 1, 16, 64>}, {transform_indices = @transform_1, window_bounds = array<i64: 1, 64, 256>}, {transform_indices = @transform_2, window_bounds = array<i64: 1, 1, 256>}, {transform_indices = @transform_3, window_bounds = array<i64: 1, 128, 64>}, {transform_indices = @transform_4, window_bounds = array<i64: 1, 1, 64>}, {transform_indices = @transform_5, window_bounds = array<i64: 1, 64, 128>}, {transform_indices = @transform_6, window_bounds = array<i64: 1, 1, 128>}, {transform_indices = @transform_7, window_bounds = array<i64: 1, 16, 128>}, {transform_indices = @transform_8, window_bounds = array<i64: 1, 16, 128>}]} {
    %c0 = arith.constant 0 : index
    %c0_0 = arith.constant 0 : index
    %c0_1 = arith.constant 0 : index
    %0 = vector.load %arg2[%c0, %c0_0, %c0_1] : memref<1x16x64xf32, #tpu.memory_space<vmem>>, vector<1x16x64xf32>
    %1 = vector.shape_cast %0 : vector<1x16x64xf32> to vector<16x64xf32>
    %c0_2 = arith.constant 0 : index
    %c0_3 = arith.constant 0 : index
    %c0_4 = arith.constant 0 : index
    %2 = vector.load %arg3[%c0_2, %c0_3, %c0_4] : memref<1x64x256xf32, #tpu.memory_space<vmem>>, vector<1x64x256xf32>
    %3 = vector.shape_cast %2 : vector<1x64x256xf32> to vector<64x256xf32>
    %cst = arith.constant dense<0.000000e+00> : vector<16x256xf32>
    %4 = tpu.matmul %1, %3, %cst {dimension_numbers = #tpu.dot_dimension_numbers<[1], [0], [0], [1], [0, 0, 1, 1], [], []>} : vector<16x64xf32>, vector<64x256xf32>, vector<16x256xf32> -> vector<16x256xf32>
    %c0_5 = arith.constant 0 : index
    %c0_6 = arith.constant 0 : index
    %c0_7 = arith.constant 0 : index
    %5 = vector.load %arg4[%c0_5, %c0_6, %c0_7] : memref<1x1x256xf32, #tpu.memory_space<vmem>>, vector<1x1x256xf32>
    %6 = vector.shape_cast %5 : vector<1x1x256xf32> to vector<1x256xf32>
    %7 = vector.broadcast %6 : vector<1x256xf32> to vector<16x256xf32>
    %8 = arith.addf %4, %7 : vector<16x256xf32>
    %9 = vector.extract_strided_slice %8 {offsets = [0, 0], sizes = [16, 128], strides = [1, 1]} : vector<16x256xf32> to vector<16x128xf32>
    %c0_8 = arith.constant 0 : index
    %c0_9 = arith.constant 0 : index
    %c0_10 = arith.constant 0 : index
    %10 = vector.load %arg9[%c0_8, %c0_9, %c0_10] : memref<1x16x128xf32, #tpu.memory_space<vmem>>, vector<1x16x128xf32>
    %11 = vector.shape_cast %10 : vector<1x16x128xf32> to vector<16x128xf32>
    %12 = vector.shape_cast %9 : vector<16x128xf32> to vector<1x16x128xf32>
    tpu.vector_store %arg9[%c0_8, %c0_9, %c0_10], %12 {strides = array<i32>} : memref<1x16x128xf32, #tpu.memory_space<vmem>>, vector<1x16x128xf32>,
    %13 = vector.extract_strided_slice %8 {offsets = [0, 128], sizes = [16, 128], strides = [1, 1]} : vector<16x256xf32> to vector<16x128xf32>
    %cst_11 = arith.constant 0.000000e+00 : f32
    %14 = vector.broadcast %cst_11 : f32 to vector<16x128xf32>
    %15 = arith.maximumf %13, %14 : vector<16x128xf32>
    %c0_12 = arith.constant 0 : index
    %c0_13 = arith.constant 0 : index
    %c0_14 = arith.constant 0 : index
    %16 = vector.load %arg5[%c0_12, %c0_13, %c0_14] : memref<1x128x64xf32, #tpu.memory_space<vmem>>, vector<1x128x64xf32>
    %17 = vector.shape_cast %16 : vector<1x128x64xf32> to vector<128x64xf32>
    %cst_15 = arith.constant dense<0.000000e+00> : vector<16x64xf32>
    %18 = tpu.matmul %15, %17, %cst_15 {dimension_numbers = #tpu.dot_dimension_numbers<[1], [0], [0], [1], [0, 0, 1, 1], [], []>} : vector<16x128xf32>, vector<128x64xf32>, vector<16x64xf32> -> vector<16x64xf32>
    %c0_16 = arith.constant 0 : index
    %c0_17 = arith.constant 0 : index
    %c0_18 = arith.constant 0 : index
    %19 = vector.load %arg6[%c0_16, %c0_17, %c0_18] : memref<1x1x64xf32, #tpu.memory_space<vmem>>, vector<1x1x64xf32>
    %20 = vector.shape_cast %19 : vector<1x1x64xf32> to vector<1x64xf32>
    %21 = vector.broadcast %20 : vector<1x64xf32> to vector<16x64xf32>
    %22 = arith.addf %18, %21 : vector<16x64xf32>
    %cst_19 = arith.constant 0.000000e+00 : f32
    %23 = vector.broadcast %cst_19 : f32 to vector<16x64xf32>
    %24 = arith.maximumf %22, %23 : vector<16x64xf32>
    %c0_20 = arith.constant 0 : index
    %c0_21 = arith.constant 0 : index
    %c0_22 = arith.constant 0 : index
    %25 = vector.load %arg7[%c0_20, %c0_21, %c0_22] : memref<1x64x128xf32, #tpu.memory_space<vmem>>, vector<1x64x128xf32>
    %26 = vector.shape_cast %25 : vector<1x64x128xf32> to vector<64x128xf32>
    %cst_23 = arith.constant dense<0.000000e+00> : vector<16x128xf32>
    %27 = tpu.matmul %24, %26, %cst_23 {dimension_numbers = #tpu.dot_dimension_numbers<[1], [0], [0], [1], [0, 0, 1, 1], [], []>} : vector<16x64xf32>, vector<64x128xf32>, vector<16x128xf32> -> vector<16x128xf32>
    %c0_24 = arith.constant 0 : index
    %c0_25 = arith.constant 0 : index
    %c0_26 = arith.constant 0 : index
    %28 = vector.load %arg8[%c0_24, %c0_25, %c0_26] : memref<1x1x128xf32, #tpu.memory_space<vmem>>, vector<1x1x128xf32>
    %29 = vector.shape_cast %28 : vector<1x1x128xf32> to vector<1x128xf32>
    %30 = vector.broadcast %29 : vector<1x128xf32> to vector<16x128xf32>
    %31 = arith.addf %27, %30 : vector<16x128xf32>
    %32 = arith.negf %31 : vector<16x128xf32>
    %33 = math.exp %32 : vector<16x128xf32>
    %cst_27 = arith.constant 1.000000e+00 : f32
    %34 = vector.broadcast %cst_27 : f32 to vector<16x128xf32>
    %35 = arith.addf %34, %33 : vector<16x128xf32>
    %36 = arith.divf %34, %35 : vector<16x128xf32>
    %c0_28 = arith.constant 0 : index
    %c0_29 = arith.constant 0 : index
    %c0_30 = arith.constant 0 : index
    %37 = vector.load %arg10[%c0_28, %c0_29, %c0_30] : memref<1x16x128xf32, #tpu.memory_space<vmem>>, vector<1x16x128xf32>
    %38 = vector.shape_cast %37 : vector<1x16x128xf32> to vector<16x128xf32>
    %39 = vector.shape_cast %36 : vector<16x128xf32> to vector<1x16x128xf32>
    tpu.vector_store %arg10[%c0_28, %c0_29, %c0_30], %39 {strides = array<i32>} : memref<1x16x128xf32, #tpu.memory_space<vmem>>, vector<1x16x128xf32>,
    return
  }
  func.func @transform_0(%arg0: i32, %arg1: i32) -> (i32, i32, i32) {
    %c0_i32 = arith.constant 0 : i32
    %c0_i32_0 = arith.constant 0 : i32
    return %arg0, %arg1, %c0_i32 : i32, i32, i32
  }
  func.func @transform_1(%arg0: i32, %arg1: i32) -> (i32, i32, i32) {
    %c0_i32 = arith.constant 0 : i32
    %c0_i32_0 = arith.constant 0 : i32
    %c0_i32_1 = arith.constant 0 : i32
    return %arg0, %c0_i32, %c0_i32_0 : i32, i32, i32
  }
  func.func @transform_2(%arg0: i32, %arg1: i32) -> (i32, i32, i32) {
    %c0_i32 = arith.constant 0 : i32
    %c0_i32_0 = arith.constant 0 : i32
    %c0_i32_1 = arith.constant 0 : i32
    return %arg0, %c0_i32, %c0_i32_0 : i32, i32, i32
  }
  func.func @transform_3(%arg0: i32, %arg1: i32) -> (i32, i32, i32) {
    %c0_i32 = arith.constant 0 : i32
    %c0_i32_0 = arith.constant 0 : i32
    %c0_i32_1 = arith.constant 0 : i32
    return %arg0, %c0_i32, %c0_i32_0 : i32, i32, i32
  }
  func.func @transform_4(%arg0: i32, %arg1: i32) -> (i32, i32, i32) {
    %c0_i32 = arith.constant 0 : i32
    %c0_i32_0 = arith.constant 0 : i32
    %c0_i32_1 = arith.constant 0 : i32
    return %arg0, %c0_i32, %c0_i32_0 : i32, i32, i32
  }
  func.func @transform_5(%arg0: i32, %arg1: i32) -> (i32, i32, i32) {
    %c0_i32 = arith.constant 0 : i32
    %c0_i32_0 = arith.constant 0 : i32
    %c0_i32_1 = arith.constant 0 : i32
    return %arg0, %c0_i32, %c0_i32_0 : i32, i32, i32
  }
  func.func @transform_6(%arg0: i32, %arg1: i32) -> (i32, i32, i32) {
    %c0_i32 = arith.constant 0 : i32
    %c0_i32_0 = arith.constant 0 : i32
    %c0_i32_1 = arith.constant 0 : i32
    return %arg0, %c0_i32, %c0_i32_0 : i32, i32, i32
  }
  func.func @transform_7(%arg0: i32, %arg1: i32) -> (i32, i32, i32) {
    %c0_i32 = arith.constant 0 : i32
    %c0_i32_0 = arith.constant 0 : i32
    return %arg0, %arg1, %c0_i32 : i32, i32, i32
  }
  func.func @transform_8(%arg0: i32, %arg1: i32) -> (i32, i32, i32) {
    %c0_i32 = arith.constant 0 : i32
    %c0_i32_0 = arith.constant 0 : i32
    return %arg0, %arg1, %c0_i32 : i32, i32, i32
  }
}

</mosaic_0001>

<bundles_post_ra>
// kernel: tpu_custom_call.1
= control target key start
LH: loop header
LB: loop body
LE: loop exit
PB: predicated region body
PF: predicated region fallthrough
CT: control target
= control target key end

     0   :  { %s1288_s27 = smov 0   ;;  %s1290_s28 = smov 0   ;;  %s1407_s0 = inlined_call_operand.vmem [shape: f32[2,15,64], index: 0, kind: input, shape index: {}]   ;;  %s1408_s1 = inlined_call_operand.vmem [shape: f32[2,64,256], index: 1, kind: input, shape index: {}]   ;;  %s1409_s2 = inlined_call_operand.vmem [shape: f32[2,1,256], index: 2, kind: input, shape index: {}]   ;;  %s1410_s3 = inlined_call_operand.vmem [shape: f32[2,128,64], index: 3, kind: input, shape index: {}]   ;;  %s1411_s4 = inlined_call_operand.vmem [shape: f32[2,1,64], index: 4, kind: input, shape index: {}]   ;;  %s1412_s5 = inlined_call_operand.vmem [shape: f32[2,64,128], index: 5, kind: input, shape index: {}]   ;;  %s1413_s6 = inlined_call_operand.vmem [shape: f32[2,1,128], index: 6, kind: input, shape index: {}]   ;;  %s1414_s7 = inlined_call_operand.vmem [shape: f32[2,15,128], index: 7, kind: output, shape index: {0}]   ;;  %s1415_s8 = inlined_call_operand.vmem [shape: f32[2,15,128], index: 8, kind: output, shape index: {1}]  }
   0x1   :  { %s1292_s29 = smov 0  }
   0x2 LB: > { %s31_s30 = sadd.s32 1, %s1236_s28  ;;  %p1009_p0 = scmp.ge.s32.totalorder %s1240_s29, 1  ;;  %s1240_s29 = sphi %s1292_s29, %s19_s29   ;;  %s1236_s28 = sphi %s1290_s28, %s1417_s28   ;;  %s1232_s27 = sphi %s1288_s27, %s1416_s27  }
   0x3   : > { %p33_p1 = scmp.ge.s32.totalorder %s31_s30, 2  ;;  %p343_p2 = scmp.lt.s32.totalorder %s1240_s29, 3 }
   0x5   : > { %s1419_s30 = smov (%p33_p1, %s31_s30), 0  ;;  %p344_p3 = pnand %p1009_p0, %p343_p2 }
   0x6   : > { %p420_p4 = scmp.lt.s32.totalorder (!%p344_p3), %s1232_s27, 1  ;;  %v1242_v0 = vmov (!%p344_p3), 0.0   ;;  %vm504_vm0 = vcmask (!%p344_p3), 523264   ;;  %v494_v60 = vlaneseq (!%p344_p3) }
   0x7   : > { %347 = sbr.rel (%p344_p3) target bundleno = 717 (0x2cd), region = 48  ;;  %575 = vmatprep.mubr.f32.mxu0 (!%p344_p3), %v1242_v0 }
   0x8   : > { %v495_v61 = vshrl.u32 (!%p344_p3), %v494_v60, 7 }
   0xa   : > { %v496_v62 = vsub.s32 (!%p344_p3), 0, %v495_v61 }
   0xe   : > { %s1421_s27 = smov (!%p420_p4, %s1232_s27), 1 }
   0xf   : > { %s1034_s9 = sshll.u32 %s1421_s27, 7  ;;  %s1343_s16 = sshll.u32 %s1421_s27, 4 }
  0x10   : > { %s1313_s12 = scalar_lea.vmem %s1408_s1, %s1034_s9  ;;  %s1328_s15 = scalar_lea.vmem %s1410_s3, %s1034_s9 }
  0x11   : > { %v477_v1 = vld [vmem:[%s1313_s12 + $0x8] sm:$0xff]  ;;  %v479_v2 = vld [vmem:[%s1313_s12 + $0x18] sm:$0xff]  ;;  %v476_v3 = vld [vmem:[%s1313_s12] sm:$0xff]  ;;  %s427_s19 = scalar_lea.vmem %s1407_s0, %s1343_s16  ;;  %s1036_s20 = sshll.u32 %s1421_s27, 6 }
  0x12   : > { %v1121_v4 = vpack.c.bf16 %v479_v2, %v477_v1  ;;  %v478_v5 = vld [vmem:[%s1313_s12 + $0x10] sm:$0xff]  ;;  %v481_v6 = vld [vmem:[%s1313_s12 + $0x28] sm:$0xff]  ;;  %v483_v7 = vld [vmem:[%s1313_s12 + $0x38] sm:$0xff]  ;;  %s1366_s23 = scalar_lea.vmem %s1412_s5, %s1036_s20  ;;  %s1014_s24 = sshll.u32 %s1421_s27, 1 }
  0x13   : > { %v1123_v8 = vpack.c.bf16 %v478_v5, %v476_v3  ;;  %v1125_v9 = vpack.c.bf16 %v483_v7, %v481_v6  ;;  %v480_v10 = vld [vmem:[%s1313_s12 + $0x20] sm:$0xff]  ;;  %v482_v11 = vld [vmem:[%s1313_s12 + $0x30] sm:$0xff]  ;;  %v485_v12 = vld [vmem:[%s1313_s12 + $0x48] sm:$0xff]  ;;  %s437_s9 = scalar_lea.vmem %s1409_s2, %s1014_s24 }
  0x14   : > { %1122 = vmatprep.subr.bf16.mxu0 %v1121_v4  ;;  %v487_v13 = vld [vmem:[%s1313_s12 + $0x58] sm:$0xff]  ;;  %v1127_v14 = vpack.c.bf16 %v482_v11, %v480_v10  ;;  %v484_v15 = vld [vmem:[%s1313_s12 + $0x40] sm:$0xff]  ;;  %v486_v17 = vld [vmem:[%s1313_s12 + $0x50] sm:$0xff] }
  0x15   : > { %1124 = vmatpush1.bf16.msra.mxu0 %v1123_v8  ;;  %v1129_v16 = vpack.c.bf16 %v487_v13, %v485_v12  ;;  %v489_v18 = vld [vmem:[%s1313_s12 + $0x68] sm:$0xff]  ;;  %v491_v19 = vld [vmem:[%s1313_s12 + $0x78] sm:$0xff]  ;;  %v592_v20 = vld [vmem:[%s1328_s15] sm:$0xff]  ;;  %v1131_v25 = vpack.c.bf16 %v486_v17, %v484_v15 }
  0x16   : > { %1126 = vmatprep.subr.bf16.mxu0 %v1125_v9  ;;  %v593_v21 = vld [vmem:[%s1328_s15 + $0x8] sm:$0xff]  ;;  %v594_v22 = vld [vmem:[%s1328_s15 + $0x10] sm:$0xff]  ;;  %v595_v24 = vld [vmem:[%s1328_s15 + $0x18] sm:$0xff]  ;;  %v1133_v29 = vpack.c.bf16 %v491_v19, %v489_v18 }
  0x17   : > { %v1137_v23 = vpack.c.bf16 %v593_v21, %v592_v20  ;;  %v1141_v26 = vpack.c.bf16 %v595_v24, %v594_v22  ;;  %v596_v27 = vld [vmem:[%s1328_s15 + $0x20] sm:$0xff]  ;;  %v597_v28 = vld [vmem:[%s1328_s15 + $0x28] sm:$0xff]  ;;  %v490_v31 = vld [vmem:[%s1313_s12 + $0x70] sm:$0xff] }
  0x18   : > { %v488_v30 = vld [vmem:[%s1313_s12 + $0x60] sm:$0xff]  ;;  %v1145_v32 = vpack.c.bf16 %v597_v28, %v596_v27  ;;  %v598_v34 = vld [vmem:[%s1328_s15 + $0x30] sm:$0xff]  ;;  %v599_v35 = vld [vmem:[%s1328_s15 + $0x38] sm:$0xff]  ;;  %s462_s12 = scalar_lea.vmem %s1414_s7, %s1343_s16 }
  0x19   : > { %1128 = vmatpush1.bf16.msra.mxu0 %v1127_v14  ;;  %1138 = vmatprep.subr.bf16.mxu1 %v1137_v23  ;;  %v1135_v33 = vpack.c.bf16 %v490_v31, %v488_v30  ;;  %v1149_v36 = vpack.c.bf16 %v599_v35, %v598_v34  ;;  %v474_v37 = vld [vmem:[%s427_s19] sm:$0xff]  ;;  %v601_v39 = vld [vmem:[%s1328_s15 + $0x48] sm:$0xff]  ;;  %v602_v42 = vld [vmem:[%s1328_s15 + $0x50] sm:$0xff] }
  0x1a   : > { %1130 = vmatprep.subr.bf16.mxu0 %v1129_v16  ;;  %1140 = vmatpush3.bf16.msra.mxu1 %v1137_v23  ;;  %v600_v38 = vld [vmem:[%s1328_s15 + $0x40] sm:$0xff]  ;;  %v475_v41 = vld [vmem:[%s427_s19 + $0x8] sm:$0xff]  ;;  %v603_v43 = vld [vmem:[%s1328_s15 + $0x58] sm:$0xff]  ;;  %s453_s19 = scalar_lea.vmem %s1413_s6, %s1421_s27 }
  0x1b   : > { %1142 = vmatprep.subr.bf16.mxu1 %v1141_v26  ;;  %v1153_v40 = vpack.c.bf16 %v601_v39, %v600_v38  ;;  %v1157_v44 = vpack.c.bf16 %v603_v43, %v602_v42  ;;  %v604_v45 = vld [vmem:[%s1328_s15 + $0x60] sm:$0xff]  ;;  %v605_v46 = vld [vmem:[%s1328_s15 + $0x68] sm:$0xff]  ;;  %v606_v48 = vld [vmem:[%s1328_s15 + $0x70] sm:$0xff] }
  0x1c   : > { %v1161_v47 = vpack.c.bf16 %v605_v46, %v604_v45  ;;  %v607_v49 = vld [vmem:[%s1328_s15 + $0x78] sm:$0xff]  ;;  %v692_v51 = vld [vmem:[%s1366_s23] sm:$0xff]  ;;  %v693_v52 = vld [vmem:[%s1366_s23 + $0x8] sm:$0xff]  ;;  %s445_s15 = scalar_lea.vmem %s1411_s4, %s1421_s27  ;;  %s472_s27 = scalar_lea.vmem %s1415_s8, %s1343_s16 }
  0x1d   : > { %1132 = vmatpush1.bf16.msra.mxu0 %v1131_v25  ;;  %v1165_v50 = vpack.c.bf16 %v607_v49, %v606_v48  ;;  %v694_v53 = vld [vmem:[%s1366_s23 + $0x10] sm:$0xff]  ;;  %v1169_v54 = vpack.c.bf16 %v693_v52, %v692_v51  ;;  %v695_v55 = vld [vmem:[%s1366_s23 + $0x18] sm:$0xff]  ;;  %v696_v57 = vld [vmem:[%s1366_s23 + $0x20] sm:$0xff] }
  0x1e   : > { %1134 = vmatprep.subr.bf16.mxu0 %v1133_v29  ;;  %1144 = vmatpush3.bf16.msra.mxu1 %v1141_v26  ;;  %v1173_v56 = vpack.c.bf16 %v695_v55, %v694_v53  ;;  %v697_v58 = vld [vmem:[%s1366_s23 + $0x28] sm:$0xff]  ;;  %v492_v63 = vld [vmem:[%s437_s9] sm:$0x3]  ;;  %v698_v13 = vld [vmem:[%s1366_s23 + $0x30] sm:$0xff] }
  0x1f   : > { %1146 = vmatprep.subr.bf16.mxu1 %v1145_v32  ;;  %v1177_v59 = vpack.c.bf16 %v697_v58, %v696_v57  ;;  %v497_v1 = vrot.slane %v492_v63, %v496_v62  ;;  %v699_v14 = vld [vmem:[%s1366_s23 + $0x38] sm:$0xff]  ;;  %v1025_v16 = vld [vmem:[%s445_s15] ss:$0 sm:$0xff] }
  0x20   : > { %v1181_v15 = vpack.c.bf16 %v699_v14, %v698_v13  ;;  %v1026_v23 = vld [vmem:[%s453_s19] ss:$0 sm:$0xff] }
  0x21   : > { %1136 = vmatpush1.bf16.msra.mxu0 %v1135_v33 }
  0x22   : > { %1148 = vmatpush3.bf16.msra.mxu1 %v1145_v32  ;;  %1170 = vmatprep.subr.bf16.mxu0 %v1169_v54 }
  0x23   : > { %1150 = vmatprep.subr.bf16.mxu1 %v1149_v36 }
  0x24   : > { %1023 = vmatmul.mubr.msk.f32.vlgmr.msra.gmra.mrb[0].mxu0 %vm504_vm0, %v474_v37 }
  0x25   : > { %581 = vmatprep.mubr.f32.mxu0 %v1242_v0  ;;  %1172 = vmatpush3.bf16.msra.mxu0 %v1169_v54  ;;  %v500_v0 = vsub.s32 1, %v495_v61 }
  0x26   : > { %1152 = vmatpush3.bf16.msra.mxu1 %v1149_v36  ;;  %1174 = vmatprep.subr.bf16.mxu0 %v1173_v56 }
  0x27   : > { %1154 = vmatprep.subr.bf16.mxu1 %v1153_v40  ;;  %v501_v2 = vrot.slane %v492_v63, %v500_v0 }
  0x28   : > { %1024 = vmatmul.mubr.msk.f32.gmra.mrb[2].mxu0 %vm504_vm0, %v475_v41 }
  0x29   : > { %1176 = vmatpush3.bf16.msra.mxu0 %v1173_v56 }
  0x2a   : > { %1156 = vmatpush3.bf16.msra.mxu1 %v1153_v40  ;;  %1178 = vmatprep.subr.bf16.mxu0 %v1177_v59 }
  0x2b   : > { %1158 = vmatprep.subr.bf16.mxu1 %v1157_v44 }
  0x2d   : > { %1180 = vmatpush3.bf16.msra.mxu0 %v1177_v59 }
  0x2e   : > { %1160 = vmatpush3.bf16.msra.mxu1 %v1157_v44  ;;  %1182 = vmatprep.subr.bf16.mxu0 %v1181_v15 }
  0x2f   : > { %1162 = vmatprep.subr.bf16.mxu1 %v1161_v47 }
  0x31   : > { %1184 = vmatpush3.bf16.msra.mxu0 %v1181_v15 }
  0x32   : > { %1164 = vmatpush3.bf16.msra.mxu1 %v1161_v47 }
  0x33   : > { %1166 = vmatprep.subr.bf16.mxu1 %v1165_v50 }
  0x36   : > { %1168 = vmatpush3.bf16.msra.mxu1 %v1165_v50 }
  0xf7   : > { %v577_v3 = vpop.f32.mrb[0].mxu0 }
  0xf8   : > { %v578_v4 = vadd.f32 %v577_v3, %v497_v1  ;;  %v579_v5 = vpop.f32.mrb[1].mxu0 }
  0xf9   : > { %v580_v6 = vadd.f32 %v579_v5, %v501_v2 }
  0xfa   : > { %588 = vst [vmem:[%s462_s12] sm:$0xff] %v578_v4 }
  0xfb   : > { %v583_v7 = vpop.f32.mrb[2].mxu0  ;;  %v590_v8 = vmax.f32 %v580_v6, 0.0 }
  0xfc   : > { %v584_v9 = vadd.f32 %v583_v7, %v497_v1  ;;  %v585_v10 = vpop.f32.mrb[3].mxu0 }
  0xfd   : > { %v586_v11 = vadd.f32 %v585_v10, %v501_v2  ;;  %1099 = vmatprep.mubr.f32.mxu1 %v590_v8 }
  0xfe   : > { %589 = vst [vmem:[%s462_s12 + $0x8] sm:$0xff] %v584_v9 }
  0xff   : > { %v591_v12 = vmax.f32 %v586_v11, 0.0 }
 0x101   : > { %1100 = vmatmul.mubr.f32.vlgmr.msra.gmra.mrb[0].mxu1 %v591_v12 }
 0x1d4   : > { %v1101_v17 = vpop.f32.mrb[0].mxu1 }
 0x1d5   : > { %v687_v18 = vadd.f32 %v1101_v17, %v1025_v16  ;;  %v681_v19 = vpop.f32.mrb[1].mxu1 }
 0x1d6   : > { %v682_v20 = vadd.f32 %v1025_v16, %v681_v19 }
 0x1d7   : > { %v691_v22 = vmax.f32 %v687_v18, 0.0 }
 0x1d8   : > { %v690_v21 = vmax.f32 %v682_v20, 0.0 }
 0x1da   : > { %1118 = vmatprep.mubr.msk.f32.mxu0 %vm504_vm0, %v690_v21 }
 0x1db   : > { %1119 = vmatmul.mubr.msk.f32.vlgmr.msra.gmra.mrb[4].mxu0 %vm504_vm0, %v691_v22 }
 0x2ae   : > { %v1120_v24 = vpop.f32.mrb[4].mxu0 }
 0x2af   : > { %v785_v25 = vadd.f32 %v1120_v24, %v1026_v23  ;;  %v779_v26 = vpop.f32.mrb[5].mxu0 }
 0x2b0   : > { %v780_v27 = vadd.f32 %v1026_v23, %v779_v26 }
 0x2b1   : > { %v1030_v28 = vmul.f32 -1.442695, %v785_v25 }
 0x2b2   : > { %v1029_v29 = vmul.f32 -1.442695, %v780_v27 }
 0x2b3   : > { %1210 = vpow2.f32 %v1030_v28 }
 0x2b4   : > { %1212 = vpow2.f32 %v1029_v29 }
 0x2bd   : > { %v1211_v30 = vpop.eup %1210 }
 0x2be   : > { %v1213_v31 = vpop.eup %1212  ;;  %v795_v32 = vadd.f32 1.0, %v1211_v30 }
 0x2bf   : > { %v794_v33 = vadd.f32 1.0, %v1213_v31 }
 0x2c0   : > { %1214 = vrcp.f32 %v795_v32 }
 0x2c1   : > { %1216 = vrcp.f32 %v794_v33 }
 0x2ca   : > { %v1215_v34 = vpop.eup %1214 }
 0x2cb   : > { %v1217_v35 = vpop.eup %1216  ;;  %801 = vst [vmem:[%s472_s27 + $0x8] sm:$0xff] %v1215_v34 }
 0x2cc   : > { %800 = vst [vmem:[%s472_s27] sm:$0xff] %v1217_v35 }
 0x2cd PF: > { %s19_s29 = sadd.s32 1, %s1240_s29   ;;  %s1416_s27 = smov %s1236_s28 }
 0x2ce   : > { %p16_p5 = scmp.ge.s32.totalorder %s19_s29, 4   ;;  %s1417_s28 = smov %s1419_s30 }
 0x2d0   :  { %18 = sbr.rel (!%p16_p5) target bundleno = 2 (0x2), region = 108 }

</bundles_post_ra>
